<compile_context>
chip_gen: v7x
topology: tpu7x:2x2x1
jax: 0.10.0
libtpu: 0.0.40
codegen_flags: <defaults>
</compile_context>

<pallas_src>
import jax
import jax.numpy as jnp
from jax.experimental import pallas as pl
from jax.experimental.pallas import tpu as pltpu

LANE = 128
SUBLANE = 8


def _round_up(x, m):
    return (x + m - 1) // m * m


def _sublane_rows(c):
    return max(SUBLANE, _round_up(c, SUBLANE))


def _pick_tile_hw(hw, cin, cout, target_tile_hw, vmem_budget_bytes):
    """Largest lane-dense tile that divides HW and fits the VMEM budget."""
    def footprint(t):
        # double-buffered x tile + double-buffered out tile (f32)
        return 2 * _sublane_rows(cin) * t * 4 + 2 * _sublane_rows(cout) * t * 4

    if hw % LANE != 0:
        # Full-extent block is always legal (block dim == array dim).
        return hw
    t = min(target_tile_hw, hw)
    t -= t % LANE
    while t > LANE:
        if hw % t == 0 and footprint(t) <= vmem_budget_bytes:
            return t
        t -= LANE
    return LANE


# ----------------------------- Pallas kernel ------------------------------ #

def outconv_kernel(x_ref, w_ref, b_ref, o_ref):
    # x_ref: (Cin, tile_hw)   activation slab (channels x pixels), lane-dense
    # w_ref: (Cout, Cin)      1x1 conv weight (grid-invariant, stays resident)
    # b_ref: (Cout, 1)        bias column (broadcast over pixels)
    # o_ref: (Cout, tile_hw)  lane-dense output slab
    acc = jnp.dot(w_ref[...], x_ref[...], preferred_element_type=jnp.float32)
    o_ref[...] = (acc + b_ref[...]).astype(o_ref.dtype)


# ------------------------------ JAX wrapper -------------------------------- #

def outconv(x_nchw, weight, bias, *, target_tile_hw=4096):
    """1x1 Conv2d forward.

    x_nchw: (B, Cin, H, W); weight: (Cout, Cin, 1, 1); bias: (Cout,).
    Returns (B, Cout, H, W), matching nn.Conv2d(Cin, Cout, kernel_size=1).
    """
    B, Cin, H, W = x_nchw.shape
    Cout = weight.shape[0]
    HW = H * W

    # Pure reshapes / dtype casts — no transpose, no pad, no Cout padding.
    x3d = x_nchw.reshape(B, Cin, HW).astype(jnp.float32)
    w2d = weight.reshape(Cout, Cin).astype(jnp.float32)
    b2d = bias.reshape(Cout, 1).astype(jnp.float32)

    # Tile the pixel (lane) axis; keep double-buffered footprint well under
    # v7x's 64 MiB physical VMEM (budget ~40 MiB for the pipelined tiles).
    vmem_tile_budget = 40 << 20
    tile_hw = _pick_tile_hw(HW, Cin, Cout, target_tile_hw, vmem_tile_budget)
    grid = (B, HW // tile_hw)

    tile_bytes = (2 * _sublane_rows(Cin) * tile_hw * 4
                  + 2 * _sublane_rows(Cout) * tile_hw * 4)
    w_bytes = 2 * _sublane_rows(Cout) * _round_up(Cin, LANE) * 4
    vmem_limit = int(min(48 << 20, max(16 << 20, 2 * (tile_bytes + w_bytes))))

    out3d = pl.pallas_call(
        outconv_kernel,
        out_shape=jax.ShapeDtypeStruct((B, Cout, HW), jnp.float32),
        grid_spec=pltpu.PrefetchScalarGridSpec(
            num_scalar_prefetch=0,
            grid=grid,
            in_specs=[
                # batch dim squeezed out of the kernel view
                pl.BlockSpec((None, Cin, tile_hw), lambda b, j: (b, 0, j)),
                pl.BlockSpec((Cout, Cin), lambda b, j: (0, 0)),   # weights
                pl.BlockSpec((Cout, 1), lambda b, j: (0, 0)),     # bias
            ],
            out_specs=pl.BlockSpec((None, Cout, tile_hw), lambda b, j: (b, 0, j)),
        ),
        compiler_params=pltpu.CompilerParams(
            dimension_semantics=("parallel", "parallel"),
            vmem_limit_bytes=vmem_limit,
        ),
    )(x3d, w2d, b2d)

    return out3d.reshape(B, Cout, H, W)


# --------------------------------- main ------------------------------------ #

if __name__ == "__main__":
    B, Cin, H, W = 2, 4, 16, 16
    Cout = 8

    key = jax.random.PRNGKey(0)
    kx, kw, kb = jax.random.split(key, 3)
    x = jax.random.normal(kx, (B, Cin, H, W), jnp.float32)       # NCHW like PyTorch

    # PyTorch Conv2d default init: uniform(-1/sqrt(fan_in), 1/sqrt(fan_in)).
    fan_in = Cin * 1 * 1
    bound = 1.0 / (fan_in ** 0.5)
    weight = jax.random.uniform(kw, (Cout, Cin, 1, 1), jnp.float32, -bound, bound)
    bias = jax.random.uniform(kb, (Cout,), jnp.float32, -bound, bound)

    fwd = jax.jit(outconv)
    out = jax.block_until_ready(fwd(x, weight, bias))

    # Pure-JAX reference check (1x1 conv == per-pixel matmul).
    ref = jnp.einsum("bchw,oc->bohw", x, weight.reshape(Cout, Cin)) \
        + bias[None, :, None, None]

    assert out.shape == (B, Cout, H, W), out.shape
    assert jnp.all(jnp.isfinite(out))
    assert jnp.allclose(out, ref, atol=1e-5, rtol=1e-5), \
        float(jnp.max(jnp.abs(out - ref)))
    print("KERNEL_OK")
</pallas_src>

<mosaic_0001>
module attributes {stable_mosaic.version = 11 : i64} {
  func.func @outconv_kernel(%arg0: i32, %arg1: i32, %arg2: memref<1x4x256xf32, #tpu.memory_space<vmem>>, %arg3: memref<8x4xf32, #tpu.memory_space<vmem>>, %arg4: memref<8x1xf32, #tpu.memory_space<vmem>>, %arg5: memref<1x8x256xf32, #tpu.memory_space<vmem>>) attributes {dimension_semantics = [#tpu.dimension_semantics<parallel>, #tpu.dimension_semantics<parallel>], iteration_bounds = array<i64: 2, 1>, scalar_prefetch = 0 : i64, scratch_operands = 0 : i64, tpu.core_type = #tpu.core_type<tc>, window_params = [{transform_indices = @transform_0, window_bounds = array<i64: 1, 4, 256>}, {pipeline_mode = #tpu.pipeline_mode<synchronous>, transform_indices = @transform_1, window_bounds = array<i64: 8, 4>}, {pipeline_mode = #tpu.pipeline_mode<synchronous>, transform_indices = @transform_2, window_bounds = array<i64: 8, 1>}, {transform_indices = @transform_3, window_bounds = array<i64: 1, 8, 256>}]} {
    %c0 = arith.constant 0 : index
    %c0_0 = arith.constant 0 : index
    %0 = vector.load %arg3[%c0, %c0_0] : memref<8x4xf32, #tpu.memory_space<vmem>>, vector<8x4xf32>
    %c0_1 = arith.constant 0 : index
    %c0_2 = arith.constant 0 : index
    %c0_3 = arith.constant 0 : index
    %1 = vector.load %arg2[%c0_1, %c0_2, %c0_3] : memref<1x4x256xf32, #tpu.memory_space<vmem>>, vector<1x4x256xf32>
    %2 = vector.shape_cast %1 : vector<1x4x256xf32> to vector<4x256xf32>
    %cst = arith.constant dense<0.000000e+00> : vector<8x256xf32>
    %3 = tpu.matmul %0, %2, %cst {dimension_numbers = #tpu.dot_dimension_numbers<[1], [0], [0], [1], [0, 0, 1, 1], [], []>} : vector<8x4xf32>, vector<4x256xf32>, vector<8x256xf32> -> vector<8x256xf32>
    %c0_4 = arith.constant 0 : index
    %c0_5 = arith.constant 0 : index
    %4 = vector.load %arg4[%c0_4, %c0_5] : memref<8x1xf32, #tpu.memory_space<vmem>>, vector<8x1xf32>
    %5 = vector.broadcast %4 : vector<8x1xf32> to vector<8x256xf32>
    %6 = arith.addf %3, %5 : vector<8x256xf32>
    %c0_6 = arith.constant 0 : index
    %c0_7 = arith.constant 0 : index
    %c0_8 = arith.constant 0 : index
    %7 = vector.load %arg5[%c0_6, %c0_7, %c0_8] : memref<1x8x256xf32, #tpu.memory_space<vmem>>, vector<1x8x256xf32>
    %8 = vector.shape_cast %7 : vector<1x8x256xf32> to vector<8x256xf32>
    %9 = vector.shape_cast %6 : vector<8x256xf32> to vector<1x8x256xf32>
    tpu.vector_store %arg5[%c0_6, %c0_7, %c0_8], %9 {strides = array<i32>} : memref<1x8x256xf32, #tpu.memory_space<vmem>>, vector<1x8x256xf32>,
    return
  }
  func.func @transform_0(%arg0: i32, %arg1: i32) -> (i32, i32, i32) {
    %c0_i32 = arith.constant 0 : i32
    %c0_i32_0 = arith.constant 0 : i32
    return %arg0, %c0_i32, %arg1 : i32, i32, i32
  }
  func.func @transform_1(%arg0: i32, %arg1: i32) -> (i32, i32) {
    %c0_i32 = arith.constant 0 : i32
    %c0_i32_0 = arith.constant 0 : i32
    %c0_i32_1 = arith.constant 0 : i32
    return %c0_i32, %c0_i32_0 : i32, i32
  }
  func.func @transform_2(%arg0: i32, %arg1: i32) -> (i32, i32) {
    %c0_i32 = arith.constant 0 : i32
    %c0_i32_0 = arith.constant 0 : i32
    %c0_i32_1 = arith.constant 0 : i32
    return %c0_i32, %c0_i32_0 : i32, i32
  }
  func.func @transform_3(%arg0: i32, %arg1: i32) -> (i32, i32, i32) {
    %c0_i32 = arith.constant 0 : i32
    %c0_i32_0 = arith.constant 0 : i32
    return %arg0, %c0_i32, %arg1 : i32, i32, i32
  }
}

</mosaic_0001>

<bundles_post_ra>
// kernel: outconv.1
= control target key start
LH: loop header
LB: loop body
LE: loop exit
PB: predicated region body
PF: predicated region fallthrough
CT: control target
= control target key end

     0   :  { %s479_s12 = smov 0   ;;  %s481_s13 = smov 0   ;;  %s518_s0 = inlined_call_operand.vmem [shape: f32[2,4,256], index: 0, kind: input, shape index: {}]   ;;  %s519_s1 = inlined_call_operand.vmem [shape: f32[8,4], index: 1, kind: input, shape index: {}]   ;;  %s520_s2 = inlined_call_operand.vmem [shape: f32[8,1], index: 2, kind: input, shape index: {}]   ;;  %s521_s3 = inlined_call_operand.vmem [shape: f32[2,8,256], index: 3, kind: output, shape index: {}]  }
   0x1   :  { %s483_s14 = smov 0  }
   0x2 LB: > { %s25_s15 = sadd.s32 1, %s451_s13  ;;  %p393_p0 = scmp.ge.s32.totalorder %s455_s14, 1  ;;  %s455_s14 = sphi %s483_s14, %s13_s14   ;;  %s451_s13 = sphi %s481_s13, %s523_s13   ;;  %s447_s12 = sphi %s479_s12, %s522_s12  }
   0x3   : > { %p27_p1 = scmp.ge.s32.totalorder %s25_s15, 2  ;;  %p158_p2 = scmp.lt.s32.totalorder %s455_s14, 3 }
   0x5   : > { %s525_s15 = smov (%p27_p1, %s25_s15), 0  ;;  %p159_p3 = pnand %p393_p0, %p158_p2 }
   0x6   : > { %p191_p4 = scmp.lt.s32.totalorder (!%p159_p3), %s447_s12, 1  ;;  %v457_v0 = vmov (!%p159_p3), 0.0   ;;  %v458_v1 = vmov (!%p159_p3), 0   ;;  %v212_v2 = vld [vmem:[%s520_s2] sm:$0xff] (!%p159_p3)  ;;  %vm224_vm0 = vcmask (!%p159_p3), 1043456   ;;  %vm220_vm1 = vcmask (!%p159_p3), 31744  }
   0x7   : > { %162 = sbr.rel (%p159_p3) target bundleno = 238 (0xee), region = 32  ;;  %293 = vmatprep.mubr.f32.mxu0 (!%p159_p3), %v457_v0  ;;  %431 = vset.pattern.permute.xlu0 (!%p159_p3), %v458_v1  ;;  %v210_v5 = vld [vmem:[%s519_s1] sm:$0xff] (!%p159_p3) }
   0x8   : > { %215 = vperm.xlu0 (!%p159_p3), %431, %v212_v2  }
   0xe   : > { %s527_s12 = smov (!%p191_p4, %s447_s12), 1 }
   0xf   : > { %s403_s18 = sshll.u32 %s527_s12, 3  ;;  %s404_s24 = sshll.u32 %s527_s12, 4 }
  0x10   : > { %s198_s21 = scalar_lea.vmem %s518_s0, %s403_s18  ;;  %s208_s27 = scalar_lea.vmem %s521_s3, %s404_s24 }
  0x11   : > { %v211_v3 = vld [vmem:[%s198_s21] sm:$0xff] }
  0x12   : > { %v219_v4 = vcombine.high %v211_v3, %v211_v3 }
  0x14   : > { %398 = vmatprep.subr.msk.mxu0 %vm224_vm0, %v219_v4 }
  0x15   : > { %399 = vmatpush1.msk.msra.mxu0 %vm224_vm0, %v211_v3 }
  0x16   : > { %400 = vmatmul.mubr.msk.f32.vlgmr.msra.gmra.mrb[0].mxu0 %vm220_vm1, %v210_v5 }
  0x87   : > { %v216_v6 = vpop.permute.xlu0 %215 }
  0xe9   : > { %v295_v7 = vpop.f32.mrb[0].mxu0 }
  0xea   : > { %v296_v8 = vadd.f32 %v295_v7, %v216_v6  ;;  %v297_v9 = vpop.f32.mrb[1].mxu0 }
  0xeb   : > { %v298_v10 = vadd.f32 %v297_v9, %v216_v6 }
  0xec   : > { %300 = vst [vmem:[%s208_s27] sm:$0xff] %v296_v8 }
  0xed   : > { %301 = vst [vmem:[%s208_s27 + $0x8] sm:$0xff] %v298_v10 }
  0xee PF: > { %s13_s14 = sadd.s32 1, %s455_s14   ;;  %s522_s12 = smov %s451_s13 }
  0xef   : > { %p10_p5 = scmp.ge.s32.totalorder %s13_s14, 4   ;;  %s523_s13 = smov %s525_s15 }
  0xf1   :  { %12 = sbr.rel (!%p10_p5) target bundleno = 2 (0x2), region = 62 }

</bundles_post_ra>
